<compile_context>
chip_gen: v5e
topology: v5e:2x2
jax: 0.10.0
libtpu: 0.0.40
codegen_flags: <defaults>
</compile_context>

<pallas_src>
import jax
import jax.numpy as jnp
from jax import lax
from jax.experimental import pallas as pl
from jax.experimental.pallas import tpu as pltpu


def mlp_kernel(x_ref, w1_ref, b1_ref, w2_ref, b2_ref, w5_ref, b5_ref, o_ref):
    x = x_ref[...]                                           # [TB, 10] batch-major

    # fc1 + relu.  Fold the transpose into the matmul: contract dim 1 of
    # W1 [10,10] with dim 1 (features) of x [TB,10] -> h1 = W1 @ x^T  [10, TB].
    h1 = lax.dot_general(w1_ref[...], x,
                         dimension_numbers=(((1,), (1,)), ((), ())),
                         preferred_element_type=jnp.float32)
    h1 = jnp.maximum(h1 + b1_ref[...], 0.0)                  # [10, TB]

    # fc2 + relu (batch already on the lane axis).
    h2 = jnp.dot(w2_ref[...], h1, preferred_element_type=jnp.float32)
    h2 = jnp.maximum(h2 + b2_ref[...], 0.0)                  # [10, TB]

    # fc5 + sigmoid -> lane-dense [1, TB] store.
    z = jnp.dot(w5_ref[...], h2, preferred_element_type=jnp.float32)
    z = z + b5_ref[...]                                      # [1, TB]
    # sigmoid(z) == 0.5 * (1 + tanh(z/2)): single EUP transcendental, exact.
    o_ref[...] = (0.5 * (1.0 + jnp.tanh(0.5 * z))).astype(o_ref.dtype)


def _vmem_capacity_bytes():
    """Per-core VMEM capacity; conservative (v7x, 64 MiB) fallback on failure."""
    try:
        return int(pltpu.get_tpu_info().vmem_capacity_bytes)
    except Exception:
        return 64 * 1024 * 1024


# Rough per-batch-row VMEM cost of one grid step (bytes):
#   2 x lane-padded x buffers   (TB,10) -> TB*128*4 each  = 1024
#   2 x output buffers          (1,TB)  ->  8*TB*4  each  =   64
#   in-kernel relayout + h1/h2/z temporaries              ~  400  (+ margin)
_VMEM_BYTES_PER_ROW = 1600


def mlp_forward(x, params, *, tb=65536):
    """x: [B, 10] float32.  params: PyTorch-convention weights/biases.

    Returns [B, 1] float32 (same semantics as the nn.Module forward)."""
    B, F = x.shape
    w1, b1 = params["w1"], params["b1"].reshape(-1, 1)   # [10,10], [10,1]
    w2, b2 = params["w2"], params["b2"].reshape(-1, 1)   # [10,10], [10,1]
    w5, b5 = params["w5"], params["b5"].reshape(-1, 1)   # [1,10],  [1,1]

    # ---- per-generation tile sizing ------------------------------------
    vmem_cap = _vmem_capacity_bytes()
    # Keep per-step buffers ~55% of this generation's VMEM (headroom for
    # Mosaic scratch): ~23K rows/tile on v7x, ~46K on v5e/v6e.
    tb_cap = max(256, (int(0.55 * vmem_cap) // _VMEM_BYTES_PER_ROW) // 256 * 256)
    TB = min(tb, tb_cap, 128 * pl.cdiv(B, 128))   # multiple of 128 (lane width)
    TB = max(TB, 128)
    Bp = TB * pl.cdiv(B, TB)                      # padded batch
    grid = (Bp // TB,)
    vmem_limit = min(int(0.85 * vmem_cap), 96 * 1024 * 1024)

    # No transpose pass: x streams batch-major.  Only a tail pad is needed
    # when B is not a multiple of the tile (skipped entirely otherwise).
    if Bp != B:
        x = jnp.pad(x, ((0, Bp - B), (0, 0)))

    resident = lambda a: pl.BlockSpec(a.shape, lambda i: (0, 0))

    cost = pl.CostEstimate(
        flops=2 * Bp * (F * F + F * F + F),               # three matmuls
        transcendentals=Bp,                               # one tanh per row
        bytes_accessed=Bp * (F * 4 + 4) + 4 * (2 * F * F + F + F + F + 1),
    )

    outT = pl.pallas_call(
        mlp_kernel,
        out_shape=jax.ShapeDtypeStruct((1, Bp), jnp.float32),
        grid=grid,
        in_specs=[
            pl.BlockSpec((TB, F), lambda i: (i, 0)),      # streamed x tiles
            resident(w1), resident(b1),
            resident(w2), resident(b2),
            resident(w5), resident(b5),
        ],
        out_specs=pl.BlockSpec((1, TB), lambda i: (0, i)),
        compiler_params=pltpu.CompilerParams(
            dimension_semantics=("parallel",),            # v7x: 2 TCs share batch
            vmem_limit_bytes=vmem_limit,
        ),
        cost_estimate=cost,
    )(x, w1, b1, w2, b2, w5, b5)

    return outT[0, :B].reshape(B, 1)


def init_params(key):
    """Deterministic init mirroring nn.Linear: weight [out, in], bias [out]."""
    k1, k2, k3, k4, k5, k6 = jax.random.split(key, 6)
    s = 1.0 / jnp.sqrt(10.0)
    return {
        "w1": jax.random.uniform(k1, (10, 10), jnp.float32, -s, s),
        "b1": jax.random.uniform(k2, (10,), jnp.float32, -s, s),
        "w2": jax.random.uniform(k3, (10, 10), jnp.float32, -s, s),
        "b2": jax.random.uniform(k4, (10,), jnp.float32, -s, s),
        "w5": jax.random.uniform(k5, (1, 10), jnp.float32, -s, s),
        "b5": jax.random.uniform(k6, (1,), jnp.float32, -s, s),
    }


def mlp_reference(x, p):
    h1 = jnp.maximum(x @ p["w1"].T + p["b1"], 0.0)
    h2 = jnp.maximum(h1 @ p["w2"].T + p["b2"], 0.0)
    return jax.nn.sigmoid(h2 @ p["w5"].T + p["b5"])


if __name__ == "__main__":
    key = jax.random.PRNGKey(0)
    kx, kp = jax.random.split(key)

    B = 200                                  # not a multiple of 128: exercises tail pad
    x = jax.random.normal(kx, (B, 10), dtype=jnp.float32)
    params = init_params(kp)

    # Small tile so the test covers >1 grid step (pipelining path).
    out = mlp_forward(x, params, tb=128)
    out = jax.block_until_ready(out)

    ref = mlp_reference(x, params)
    assert out.shape == (B, 1)
    assert jnp.allclose(out, ref, atol=1e-5, rtol=1e-5), float(
        jnp.max(jnp.abs(out - ref)))

    # Also exercise the default (large-tile) path (clamps to one 256-wide tile here).
    out2 = jax.block_until_ready(mlp_forward(x, params))
    assert jnp.allclose(out2, ref, atol=1e-5, rtol=1e-5)

    print("KERNEL_OK")
</pallas_src>

<mosaic_0001>
module attributes {stable_mosaic.version = 11 : i64} {
  func.func @mlp_kernel(%arg0: i32, %arg1: memref<128x10xf32, #tpu.memory_space<vmem>>, %arg2: memref<10x10xf32, #tpu.memory_space<vmem>>, %arg3: memref<10x1xf32, #tpu.memory_space<vmem>>, %arg4: memref<10x10xf32, #tpu.memory_space<vmem>>, %arg5: memref<10x1xf32, #tpu.memory_space<vmem>>, %arg6: memref<1x10xf32, #tpu.memory_space<vmem>>, %arg7: memref<1x1xf32, #tpu.memory_space<vmem>>, %arg8: memref<1x128xf32, #tpu.memory_space<vmem>>) attributes {dimension_semantics = [#tpu.dimension_semantics<parallel>], iteration_bounds = array<i64: 2>, scalar_prefetch = 0 : i64, scratch_operands = 0 : i64, tpu.core_type = #tpu.core_type<tc>, window_params = [{transform_indices = @transform_0, window_bounds = array<i64: 128, 10>}, {pipeline_mode = #tpu.pipeline_mode<synchronous>, transform_indices = @transform_1, window_bounds = array<i64: 10, 10>}, {pipeline_mode = #tpu.pipeline_mode<synchronous>, transform_indices = @transform_2, window_bounds = array<i64: 10, 1>}, {pipeline_mode = #tpu.pipeline_mode<synchronous>, transform_indices = @transform_3, window_bounds = array<i64: 10, 10>}, {pipeline_mode = #tpu.pipeline_mode<synchronous>, transform_indices = @transform_4, window_bounds = array<i64: 10, 1>}, {pipeline_mode = #tpu.pipeline_mode<synchronous>, transform_indices = @transform_5, window_bounds = array<i64: 1, 10>}, {pipeline_mode = #tpu.pipeline_mode<synchronous>, transform_indices = @transform_6, window_bounds = array<i64: 1, 1>}, {transform_indices = @transform_7, window_bounds = array<i64: 1, 128>}]} {
    %c0 = arith.constant 0 : index
    %c0_0 = arith.constant 0 : index
    %0 = vector.load %arg1[%c0, %c0_0] : memref<128x10xf32, #tpu.memory_space<vmem>>, vector<128x10xf32>
    %c0_1 = arith.constant 0 : index
    %c0_2 = arith.constant 0 : index
    %1 = vector.load %arg2[%c0_1, %c0_2] : memref<10x10xf32, #tpu.memory_space<vmem>>, vector<10x10xf32>
    %cst = arith.constant dense<0.000000e+00> : vector<10x128xf32>
    %2 = tpu.matmul %1, %0, %cst {dimension_numbers = #tpu.dot_dimension_numbers<[1], [1], [0], [0], [0, 0, 1, 0], [], []>} : vector<10x10xf32>, vector<128x10xf32>, vector<10x128xf32> -> vector<10x128xf32>
    %c0_3 = arith.constant 0 : index
    %c0_4 = arith.constant 0 : index
    %3 = vector.load %arg3[%c0_3, %c0_4] : memref<10x1xf32, #tpu.memory_space<vmem>>, vector<10x1xf32>
    %4 = vector.broadcast %3 : vector<10x1xf32> to vector<10x128xf32>
    %5 = arith.addf %2, %4 : vector<10x128xf32>
    %cst_5 = arith.constant 0.000000e+00 : f32
    %6 = vector.broadcast %cst_5 : f32 to vector<10x128xf32>
    %7 = arith.maximumf %5, %6 : vector<10x128xf32>
    %c0_6 = arith.constant 0 : index
    %c0_7 = arith.constant 0 : index
    %8 = vector.load %arg4[%c0_6, %c0_7] : memref<10x10xf32, #tpu.memory_space<vmem>>, vector<10x10xf32>
    %cst_8 = arith.constant dense<0.000000e+00> : vector<10x128xf32>
    %9 = tpu.matmul %8, %7, %cst_8 {dimension_numbers = #tpu.dot_dimension_numbers<[1], [0], [0], [1], [0, 0, 1, 1], [], []>} : vector<10x10xf32>, vector<10x128xf32>, vector<10x128xf32> -> vector<10x128xf32>
    %c0_9 = arith.constant 0 : index
    %c0_10 = arith.constant 0 : index
    %10 = vector.load %arg5[%c0_9, %c0_10] : memref<10x1xf32, #tpu.memory_space<vmem>>, vector<10x1xf32>
    %11 = vector.broadcast %10 : vector<10x1xf32> to vector<10x128xf32>
    %12 = arith.addf %9, %11 : vector<10x128xf32>
    %cst_11 = arith.constant 0.000000e+00 : f32
    %13 = vector.broadcast %cst_11 : f32 to vector<10x128xf32>
    %14 = arith.maximumf %12, %13 : vector<10x128xf32>
    %c0_12 = arith.constant 0 : index
    %c0_13 = arith.constant 0 : index
    %15 = vector.load %arg6[%c0_12, %c0_13] : memref<1x10xf32, #tpu.memory_space<vmem>>, vector<1x10xf32>
    %cst_14 = arith.constant dense<0.000000e+00> : vector<1x128xf32>
    %16 = tpu.matmul %15, %14, %cst_14 {dimension_numbers = #tpu.dot_dimension_numbers<[1], [0], [0], [1], [0, 0, 1, 1], [], []>} : vector<1x10xf32>, vector<10x128xf32>, vector<1x128xf32> -> vector<1x128xf32>
    %c0_15 = arith.constant 0 : index
    %c0_16 = arith.constant 0 : index
    %17 = vector.load %arg7[%c0_15, %c0_16] : memref<1x1xf32, #tpu.memory_space<vmem>>, vector<1x1xf32>
    %18 = vector.broadcast %17 : vector<1x1xf32> to vector<1x128xf32>
    %19 = arith.addf %16, %18 : vector<1x128xf32>
    %cst_17 = arith.constant 5.000000e-01 : f32
    %20 = vector.broadcast %cst_17 : f32 to vector<1x128xf32>
    %21 = arith.mulf %20, %19 : vector<1x128xf32>
    %22 = math.tanh %21 : vector<1x128xf32>
    %cst_18 = arith.constant 1.000000e+00 : f32
    %23 = vector.broadcast %cst_18 : f32 to vector<1x128xf32>
    %24 = arith.addf %23, %22 : vector<1x128xf32>
    %cst_19 = arith.constant 5.000000e-01 : f32
    %25 = vector.broadcast %cst_19 : f32 to vector<1x128xf32>
    %26 = arith.mulf %25, %24 : vector<1x128xf32>
    %c0_20 = arith.constant 0 : index
    %c0_21 = arith.constant 0 : index
    %27 = vector.load %arg8[%c0_20, %c0_21] : memref<1x128xf32, #tpu.memory_space<vmem>>, vector<1x128xf32>
    tpu.vector_store %arg8[%c0_20, %c0_21], %26 {strides = array<i32>} : memref<1x128xf32, #tpu.memory_space<vmem>>, vector<1x128xf32>,
    return
  }
  func.func @transform_0(%arg0: i32) -> (i32, i32) {
    %c0_i32 = arith.constant 0 : i32
    %c0_i32_0 = arith.constant 0 : i32
    return %arg0, %c0_i32 : i32, i32
  }
  func.func @transform_1(%arg0: i32) -> (i32, i32) {
    %c0_i32 = arith.constant 0 : i32
    %c0_i32_0 = arith.constant 0 : i32
    %c0_i32_1 = arith.constant 0 : i32
    return %c0_i32, %c0_i32_0 : i32, i32
  }
  func.func @transform_2(%arg0: i32) -> (i32, i32) {
    %c0_i32 = arith.constant 0 : i32
    %c0_i32_0 = arith.constant 0 : i32
    %c0_i32_1 = arith.constant 0 : i32
    return %c0_i32, %c0_i32_0 : i32, i32
  }
  func.func @transform_3(%arg0: i32) -> (i32, i32) {
    %c0_i32 = arith.constant 0 : i32
    %c0_i32_0 = arith.constant 0 : i32
    %c0_i32_1 = arith.constant 0 : i32
    return %c0_i32, %c0_i32_0 : i32, i32
  }
  func.func @transform_4(%arg0: i32) -> (i32, i32) {
    %c0_i32 = arith.constant 0 : i32
    %c0_i32_0 = arith.constant 0 : i32
    %c0_i32_1 = arith.constant 0 : i32
    return %c0_i32, %c0_i32_0 : i32, i32
  }
  func.func @transform_5(%arg0: i32) -> (i32, i32) {
    %c0_i32 = arith.constant 0 : i32
    %c0_i32_0 = arith.constant 0 : i32
    %c0_i32_1 = arith.constant 0 : i32
    return %c0_i32, %c0_i32_0 : i32, i32
  }
  func.func @transform_6(%arg0: i32) -> (i32, i32) {
    %c0_i32 = arith.constant 0 : i32
    %c0_i32_0 = arith.constant 0 : i32
    %c0_i32_1 = arith.constant 0 : i32
    return %c0_i32, %c0_i32_0 : i32, i32
  }
  func.func @transform_7(%arg0: i32) -> (i32, i32) {
    %c0_i32 = arith.constant 0 : i32
    %c0_i32_0 = arith.constant 0 : i32
    return %c0_i32, %arg0 : i32, i32
  }
}

</mosaic_0001>

<bundles_post_ra>
// kernel: tpu_custom_call.1
= control target key start
LH: loop header
LB: loop body
LE: loop exit
PB: predicated region body
PF: predicated region fallthrough
CT: control target
= control target key end

     0   :  { %s914_s0 = inlined_call_operand.vmem [shape: f32[256,10], index: 0, kind: input, shape index: {}]   ;;  %s915_s1 = inlined_call_operand.vmem [shape: f32[10,10], index: 1, kind: input, shape index: {}]   ;;  %s916_s2 = inlined_call_operand.vmem [shape: f32[10,1], index: 2, kind: input, shape index: {}]   ;;  %s917_s3 = inlined_call_operand.vmem [shape: f32[10,10], index: 3, kind: input, shape index: {}]   ;;  %s918_s4 = inlined_call_operand.vmem [shape: f32[10,1], index: 4, kind: input, shape index: {}]   ;;  %s919_s5 = inlined_call_operand.vmem [shape: f32[1,10], index: 5, kind: input, shape index: {}]   ;;  %s920_s6 = inlined_call_operand.<no memory space> [shape: f32[1,1], index: 6, kind: input, shape index: {}]   ;;  %s921_s7 = inlined_call_operand.hbm [shape: f32[1,256], index: 7, kind: output, shape index: {}]  }
   0x1   :  { %v12_v0 = vstv %s920_s6 }
   0x2   :  { %13 = vst [vmem:[#allocation2] sm:$0x1] %v12_v0 }
   0x3   :  { %14 = vsyncpa [#allocation4], 0 }
   0x4   :  { %16 = vsyncpa [#allocation4 + $0x1], 0  ;;  %s746_s26 = smov 0   ;;  %s748_s27 = smov 0  }
   0x5   :  { %s750_s28 = smov 0   ;;  %s752_s29 = smov 0  }
   0x6 LB: > { %s767_s6 = sadd.s32 4294967295, %s700_s29   ;;  %s546_s30 = sadd.s32 4294967294, %s700_s29   ;;  %s700_s29 = sphi %s752_s29, %s927_s29   ;;  %s696_s28 = sphi %s750_s28, %s926_s28   ;;  %s692_s27 = sphi %s748_s27, %s925_s27   ;;  %s688_s26 = sphi %s746_s26, %s924_s26  }
   0x7   : > { %s771_s8 = sadd.s32 1, %s700_s29   ;;  %s181_s9 = sadd.s32 1, %s696_s28 }
   0x8   : > { %s178_s10 = ssub.s32 %s700_s29, %s771_s8  ;;  %p191_p0 = scmp.ne.s32.totalorder %s696_s28, %s692_s27 }
   0x9   : > { %p179_p1 = scmp.eq.s32.totalorder %s178_s10, 0  ;;  %p192_p2 = scmp.eq.s32.totalorder %s767_s6, 1 }
   0xa   : > { %p197_p3 = scmp.ne.s32.totalorder %s692_s27, %s688_s26  ;;  %p198_p4 = scmp.eq.s32.totalorder %s546_s30, 1 }
   0xb   : > { %s782_s11 = scalar_select %p179_p1, %s696_s28, %s181_s9  }
   0xc   : > { %p784_p5 = por %p192_p2, %p191_p0  ;;  %p788_p6 = por %p198_p4, %p197_p3 }
   0xd   : > { %p549_p7 = scmp.ge.s32.totalorder %s700_s29, 1  ;;  %p243_p8 = scmp.lt.s32.totalorder %s700_s29, 3 }
   0xf   : > { %p244_p9 = pnand %p549_p7, %p243_p8 }
  0x10   : > { %s550_s14 = sshll.u32 (!%p244_p9), %s767_s6, 4  ;;  %s272_s22 = sand.u32 (!%p244_p9), 1, %s692_s27  }
  0x11   : > { %247 = sbr.rel (%p244_p9) target bundleno = 519 (0x207), region = 48  ;;  %p275_p10 = scmp.lt.s32.totalorder (!%p244_p9), %s550_s14, 31 }
  0x12   : > { %s487_s25 = scalar_lea.hbm (!%p244_p9), %s921_s7, %s767_s6  ;;  %s273_s30 = scalar_lea.vmem (!%p244_p9), [#allocation3], %s272_s22 }
  0x13   : > { %s489_s9 = sshll.u32 (!%p244_p9), %s273_s30, 4  ;;  %s491_s10 = sshll.u32 (!%p244_p9), %s487_s25, 4  ;;  %s490_s9 = int_to_ptr.vmem [resolvable:$true] %s489_s9  ;;  %s492_s10 = int_to_ptr.hbm [resolvable:$true] %s491_s10 }
  0x14   : > { %s658_s6 = scalar_lea.hbm (!%p244_p9), %s921_s7, 2 }
  0x16   : > { %s929_s14 = smov (!%p275_p10, %s550_s14), 31  ;;  %vm310_vm0 = vcmask 80896   ;;  %v299_v10 = vld [vmem:[%s916_s2 + $0x8] sm:$0x3]  ;;  %v702_v12 = vmov 0   ;;  %v298_v14 = vld [vmem:[%s916_s2] sm:$0xff] }
  0x17   : > { %s551_s15 = sshll.u32 %s929_s14, 3  ;;  %633 = vset.pattern.permute.xlu0 %v702_v12  ;;  %634 = vset.pattern.permute.xlu1 %v702_v12  ;;  %v296_v20 = vld [vmem:[%s915_s1] sm:$0xff]  ;;  %v297_v21 = vld [vmem:[%s915_s1 + $0x8] sm:$0x3]  ;;  %vm410_vm1 = vcmask 1041408   ;;  %s479_s14 = scalar_lea.sflag [#allocation4], %s272_s22 }
  0x18   : > { %s798_s18 = scalar_lea.vmem %s914_s0, %s551_s15  ;;  %307 = vperm.xlu0 %633, %v299_v10   ;;  %635 = vset.pattern.permute.xlu2 %v702_v12  ;;  %v393_v22 = vld [vmem:[%s918_s4 + $0x8] sm:$0x3]  ;;  %v392_v23 = vld [vmem:[%s918_s4] sm:$0xff]  ;;  %s652_s15 = sshra.s32 %s492_s10, 4  ;;  %s653_s15 = int_to_ptr.hbm [resolvable:$true] %s652_s15 }
  0x19   : > { %v295_v1 = vld [vmem:[%s798_s18 + $0x78] sm:$0xff]  ;;  %v294_v2 = vld [vmem:[%s798_s18 + $0x70] sm:$0xff]  ;;  %v293_v3 = vld [vmem:[%s798_s18 + $0x68] sm:$0xff]  ;;  %401 = vperm.xlu1 %634, %v393_v22   ;;  %s654_s16 = scalar_lea.hbm %s653_s15, 1  ;;  %p659_p0 = scmp.lt.s32.totalorder %s653_s15, %s921_s7 }
  0x1a   : > { %552 = vmatpush.xpose.msk.msra.mxu0 %vm310_vm0, %v295_v1  ;;  %577 = vmatpush.xpose.msk.msra.mxu3 %vm310_vm0, %v295_v1  ;;  %v292_v4 = vld [vmem:[%s798_s18 + $0x60] sm:$0xff]  ;;  %v291_v5 = vld [vmem:[%s798_s18 + $0x58] sm:$0xff]  ;;  %v290_v6 = vld [vmem:[%s798_s18 + $0x50] sm:$0xff]  ;;  %p655_p11 = scmp.ne.s32.totalorder %s653_s15, %s654_s16  ;;  %p660_p1 = scmp.lt.s32.totalorder %s658_s6, %s654_s16 }
  0x1b   : > { %v289_v7 = vld [vmem:[%s798_s18 + $0x48] sm:$0xff]  ;;  %v288_v8 = vld [vmem:[%s798_s18 + $0x40] sm:$0xff]  ;;  %v287_v9 = vld [vmem:[%s798_s18 + $0x38] sm:$0xff] }
  0x1c   : > { %v286_v11 = vld [vmem:[%s798_s18 + $0x30] sm:$0xff]  ;;  %v285_v13 = vld [vmem:[%s798_s18 + $0x28] sm:$0xff]  ;;  %v284_v15 = vld [vmem:[%s798_s18 + $0x20] sm:$0xff]  ;;  %p656_p12 = pnand %p655_p11, %p784_p5  ;;  %p661_p2 = por %p660_p1, %p659_p0 }
  0x1d   : > { %v283_v16 = vld [vmem:[%s798_s18 + $0x18] sm:$0xff]  ;;  %v282_v17 = vld [vmem:[%s798_s18 + $0x10] sm:$0xff]  ;;  %v281_v18 = vld [vmem:[%s798_s18 + $0x8] sm:$0xff] }
  0x1e   : > { %553 = vmatpush.xpose.msk.msra.mxu0 %vm310_vm0, %v294_v2  ;;  %578 = vmatpush.xpose.msk.msra.mxu3 %vm310_vm0, %v294_v2  ;;  %v280_v19 = vld [vmem:[%s798_s18] sm:$0xff]  ;;  %v391_v33 = vld [vmem:[%s917_s3 + $0x8] sm:$0x3]  ;;  %p657_p13 = pneg %p656_p12 }
  0x1f   : > { %v390_v32 = vld [vmem:[%s917_s3] sm:$0xff] }
  0x20   : > { %302 = vperm.xlu0 %633, %v298_v14   ;;  %v440_v34 = vld [vmem:[#allocation2] sm:$0x1]  ;;  %p662_p3 = pnand %p661_p2, %p657_p13 }
  0x21   : > { %396 = vperm.xlu1 %634, %v392_v23   ;;  %443 = vperm.xlu2 %635, %v440_v34   ;;  %v439_v43 = vld [vmem:[%s919_s5] sm:$0x1] }
  0x22   : > { %554 = vmatpush.xpose.msk.msra.mxu0 %vm310_vm0, %v293_v3  ;;  %579 = vmatpush.xpose.msk.msra.mxu3 %vm310_vm0, %v293_v3 }
  0x26   : > { %555 = vmatpush.xpose.msk.msra.mxu0 %vm310_vm0, %v292_v4  ;;  %580 = vmatpush.xpose.msk.msra.mxu3 %vm310_vm0, %v292_v4 }
  0x2a   : > { %556 = vmatpush.xpose.msk.msra.mxu0 %vm310_vm0, %v291_v5  ;;  %581 = vmatpush.xpose.msk.msra.mxu3 %vm310_vm0, %v291_v5 }
  0x2e   : > { %557 = vmatpush.xpose.msk.msra.mxu0 %vm310_vm0, %v290_v6  ;;  %582 = vmatpush.xpose.msk.msra.mxu3 %vm310_vm0, %v290_v6 }
  0x32   : > { %558 = vmatpush.xpose.msk.msra.mxu0 %vm310_vm0, %v289_v7  ;;  %583 = vmatpush.xpose.msk.msra.mxu3 %vm310_vm0, %v289_v7 }
  0x36   : > { %559 = vmatpush.xpose.msk.msra.mxu0 %vm310_vm0, %v288_v8  ;;  %584 = vmatpush.xpose.msk.msra.mxu3 %vm310_vm0, %v288_v8 }
  0x3a   : > { %560 = vmatpush.xpose.msk.msra.mxu0 %vm310_vm0, %v287_v9  ;;  %585 = vmatpush.xpose.msk.msra.mxu3 %vm310_vm0, %v287_v9 }
  0x3e   : > { %561 = vmatpush.xpose.msk.msra.mxu0 %vm310_vm0, %v286_v11  ;;  %586 = vmatpush.xpose.msk.msra.mxu3 %vm310_vm0, %v286_v11 }
  0x42   : > { %562 = vmatpush.xpose.msk.msra.mxu0 %vm310_vm0, %v285_v13  ;;  %587 = vmatpush.xpose.msk.msra.mxu3 %vm310_vm0, %v285_v13 }
  0x46   : > { %563 = vmatpush.xpose.msk.msra.mxu0 %vm310_vm0, %v284_v15  ;;  %588 = vmatpush.xpose.msk.msra.mxu3 %vm310_vm0, %v284_v15 }
  0x4a   : > { %564 = vmatpush.xpose.msk.msra.mxu0 %vm310_vm0, %v283_v16  ;;  %589 = vmatpush.xpose.msk.msra.mxu3 %vm310_vm0, %v283_v16 }
  0x4e   : > { %565 = vmatpush.xpose.msk.msra.mxu0 %vm310_vm0, %v282_v17  ;;  %590 = vmatpush.xpose.msk.msra.mxu3 %vm310_vm0, %v282_v17 }
  0x52   : > { %566 = vmatpush.xpose.msk.msra.mxu0 %vm310_vm0, %v281_v18  ;;  %591 = vmatpush.xpose.msk.msra.mxu3 %vm310_vm0, %v281_v18 }
  0x56   : > { %567 = vmatpush.xpose.msk.msra.mxu0 %vm310_vm0, %v280_v19  ;;  %592 = vmatpush.xpose.msk.msra.mxu3 %vm310_vm0, %v280_v19 }
  0x59   : > { %568 = vmatmul.msk.f32.vlgmr.msra.gmra.mxu0 %vm310_vm0, %v296_v20  ;;  %569 = vmatmul.msk.f32.vlgmr.msra.gmra.mxu3 %vm310_vm0, %v297_v21 }
  0x7b   : > { %v444_v44 = vpop.permute.xlu2 %443 }
  0x7c   : > { %v446_v45 = vperm.slane %v444_v44, 0 }
  0x8a   : > { %v308_v24 = vpop.permute.xlu0 %307 }
  0x8b   : > { %v402_v35 = vpop.permute.xlu1 %401 }
  0x92   : > { %v303_v25 = vpop.permute.xlu0 %302 }
  0x93   : > { %v397_v37 = vpop.permute.xlu1 %396 }
  0xd6   : > { %v382_v26 = vpop.f32.mrf.mxu0 }
  0xd7   : > { %v383_v28 = vadd.f32 %v382_v26, %v303_v25 }
  0xd9   : > { %v388_v31 = vmax.f32 %v383_v28, 0.0 }
  0xdc   : > { %v385_v27 = vpop.f32.mrf.mxu3 }
  0xdd   : > { %v386_v29 = vadd.f32 %v385_v27, %v308_v24 }
  0xdf   : > { %v389_v30 = vmax.f32 %v386_v29, 0.0 }
  0xe1   : > { %570 = vmatpush.msk.msra.mxu1 %vm410_vm1, %v389_v30 }
  0xe3   : > { %429 = vmatpush.msra.mxu1 %v388_v31 }
  0xe4   : > { %571 = vmatmul.msk.f32.vlgmr.msra.gmra.mxu1 %vm310_vm0, %v390_v32 }
  0xec   : > { %572 = vmatmul.msk.f32.gmra.mxu1 %vm310_vm0, %v391_v33 }
 0x161   : > { %v431_v36 = vpop.f32.mrf.mxu1 }
 0x162   : > { %v432_v39 = vadd.f32 %v431_v36, %v397_v37 }
 0x164   : > { %v437_v42 = vmax.f32 %v432_v39, 0.0 }
 0x169   : > { %v434_v38 = vpop.f32.mrf.mxu1 }
 0x16a   : > { %v435_v40 = vadd.f32 %v434_v38, %v402_v35 }
 0x16c   : > { %v438_v41 = vmax.f32 %v435_v40, 0.0 }
 0x16e   : > { %573 = vmatpush.msk.msra.mxu2 %vm410_vm1, %v438_v41 }
 0x170   : > { %468 = vmatpush.msra.mxu2 %v437_v42 }
 0x171   : > { %574 = vmatmul.msk.f32.vlgmr.msra.gmra.mxu2 %vm310_vm0, %v439_v43 }
 0x1f4   : > { %v470_v46 = vpop.f32.mrf.mxu2 }
 0x1f5   : > { %v471_v47 = vadd.f32 %v470_v46, %v446_v45 }
 0x1f7   : > { %v473_v48 = vmul.f32 0.5, %v471_v47 }
 0x1f9   : > { %636 = vtanh.f32 %v473_v48 }
 0x1ff   : > { %v637_v49 = vpop.eup %636 }
 0x200   : > { %v475_v50 = vadd.f32 1.0, %v637_v49 }
 0x202   : > { %v476_v51 = vmul.f32 0.5, %v475_v50 }
 0x204   : > { %477 = vst [vmem:[%s273_s30] sm:$0x1] %v476_v51 }
 0x205   : > { %665 = shalt.err (!%p662_p3)
}
 0x206   : > { %593 = dma.vmem_to_hbm [thread:$0]  (%p784_p5), %s490_s9, 16, %s492_s10, %s479_s14  }
 0x207 PF: > { %p599_p4 = scmp.ge.s32.totalorder %s700_s29, 2  ;;  %s503_s21 = sand.u32 1, %s688_s26  }
 0x208   : > { %s504_s22 = scalar_lea.sflag [#allocation4], %s503_s21 }
 0x209   : > { %p596_p7 = pnand %p599_p4, %p788_p6 }
 0x20b   : > { %p597_p8 = pneg %p596_p7 }
 0x20d   : > { %683 = dma.done.wait (%p597_p8), %s504_s22, 16  }
 0x20e   : > { %685 = vsyncadd (%p597_p8), %s504_s22, 4294967280  ;;  %p19_p9 = scmp.ge.s32.totalorder %s771_s8, 4   ;;  %s924_s26 = smov %s692_s27 }
 0x20f   : > { %s925_s27 = smov %s696_s28  ;;  %s926_s28 = smov %s782_s11 }
 0x210   : > { %s927_s29 = smov %s771_s8  ;;  %21 = sbr.rel (!%p19_p9) target bundleno = 6 (0x6), region = 83 }
 0x215   :  { %509 = vsyncpa [#allocation4], 1 }
 0x216   :  { %511 = vsyncpa [#allocation4 + $0x1], 1 }

</bundles_post_ra>
